<compile_context>
chip_gen: v6e
topology: v6e:2x2x1
jax: 0.10.0
libtpu: 0.0.40
codegen_flags: <defaults>
</compile_context>

<pallas_src>
import functools

import numpy as np
import jax
import jax.numpy as jnp
from jax.experimental import pallas as pl
from jax.experimental.pallas import tpu as pltpu

BATCH = 8
INPUT_DIM = 16
NUM_TREES = 4
TREE_DEPTH = 3
NUM_LEAVES = 2 ** TREE_DEPTH          # 8
NUM_NODES = NUM_LEAVES - 1            # 7
NUM_CLASSES = 1                       # regression
HIDDEN = 128
SHRINKAGE = 0.3
BN_EPS = 1e-5

# Packed-operand layout constants (all slice offsets are multiples of 8 sublanes
# or 128 lanes, so no sub-tile relayouts are needed in-kernel).
PAD = 128                              # lane width of each per-depth slab
AL_COLS = TREE_DEPTH * PAD             # 384
TL = NUM_TREES * NUM_LEAVES            # 32 (used lanes per slab)
ROW_B1 = 16                            # A1 row holding fc1 bias
ROW_BNA = 24                           # A1 row holding folded-BN scale a
ROW_BNC = 32                           # A1 row holding folded-BN shift c
A1_ROWS = ROW_BNC + 1                  # 33


# --------------------------------------------------------------------------- #
# Kernel
# --------------------------------------------------------------------------- #
def torchboost_kernel(x_ref, a1_ref, a2_ref, al_ref, ow_ref, out_ref):
    x = x_ref[...]                                                   # (B, D) f32

    # ---- SoftTree NaN handling (shared by all trees) ----
    missing = jnp.isnan(x)
    x_clean = jnp.where(missing, jnp.zeros_like(x), x)
    missing_any = (
        jnp.max(missing.astype(jnp.float32), axis=1, keepdims=True) > 0.0
    )                                                                # (B, 1)

    # ---- AttentionNetwork: Linear -> ReLU -> BN(eval, folded FMA) -> Linear -> softmax
    h = jnp.dot(x, a1_ref[0:INPUT_DIM, :],
                preferred_element_type=jnp.float32) + a1_ref[ROW_B1:ROW_B1 + 1, :]
    h = jnp.maximum(h, 0.0)
    h = h * a1_ref[ROW_BNA:ROW_BNA + 1, :] + a1_ref[ROW_BNC:ROW_BNC + 1, :]
    scores = jnp.dot(h, a2_ref[0:HIDDEN, :],
                     preferred_element_type=jnp.float32) + a2_ref[HIDDEN:HIDDEN + 1, :]
    scores = scores - jnp.max(scores, axis=1, keepdims=True)
    e = jnp.exp(scores)
    attn = e * pl.reciprocal(jnp.sum(e, axis=1, keepdims=True), approx=False)   # (B, T)

    # ---- All trees, all depth levels: ONE signed / leaf-expanded matmul ----
    # Columns are laid out as [depth slab (128 lanes)] x [tree*NUM_LEAVES + leaf].
    z = jnp.dot(x_clean, al_ref[0:INPUT_DIM, :],
                preferred_element_type=jnp.float32) \
        + al_ref[INPUT_DIM:INPUT_DIM + 1, :]                          # (B, 384)
    dec = pl.reciprocal(1.0 + jnp.exp(-z), approx=False)              # sigmoid (EUP)
    dec = jnp.where(missing_any, jnp.full_like(dec, 0.5), dec)
    routing = dec[:, 0:PAD] * dec[:, PAD:2 * PAD] * dec[:, 2 * PAD:3 * PAD]   # (B, 128)

    # ---- Leaf mixing for all trees (block-diagonal) + shrinkage*residual scale ----
    per_tree = jnp.dot(routing, ow_ref[0:PAD, :],
                       preferred_element_type=jnp.float32)            # (B, T)
    per_tree = per_tree * ow_ref[PAD:PAD + 1, :]                      # shrinkage * resw

    # ---- Ensemble: pred = sum_t attn[:, t] * scaled_tree_output_t ----
    out_ref[...] = jnp.sum(attn * per_tree, axis=1, keepdims=True)    # (B, 1)


@jax.jit
def torchboost_forward(x, a1, a2, al, ow):
    vmem = functools.partial(pl.BlockSpec, memory_space=pltpu.MemorySpace.VMEM)
    return pl.pallas_call(
        torchboost_kernel,
        out_shape=jax.ShapeDtypeStruct((BATCH, NUM_CLASSES), jnp.float32),
        in_specs=[vmem(), vmem(), vmem(), vmem(), vmem()],
        out_specs=vmem(),
    )(x, a1, a2, al, ow)


# --------------------------------------------------------------------------- #
# Host-side one-time parameter packing / folding
# --------------------------------------------------------------------------- #
def _leaf_path_table():
    """For each leaf, the (depth, node, sign) factors produced by the
    routing_prob.repeat(1,2) * cat([dec, 1-dec]) recurrence of SoftTree."""
    factors = [[]]
    for d in range(TREE_DEPTH):
        lo = 2 ** d - 1
        n_old = len(factors)
        new = []
        for k in range(2 * n_old):
            if k < n_old:
                node, sign = lo + k, 1.0
            else:
                node, sign = lo + (k - n_old), -1.0
            new.append(factors[k % n_old] + [(d, node, sign)])
        factors = new
    node_idx = np.zeros((TREE_DEPTH, NUM_LEAVES), np.int32)
    signs = np.zeros((TREE_DEPTH, NUM_LEAVES), np.float32)
    for j, fl in enumerate(factors):
        for d, node, sign in fl:
            node_idx[d, j] = node
            signs[d, j] = sign
    return node_idx, signs


def pack_params(params):
    (w1_t, b1, gamma, beta, rmean, rvar, w2_t, b2,
     tw_t, tb, tleaf, temps, resw) = params

    # Eval-mode BatchNorm folded to one FMA: y = a*h + c.
    a_bn = gamma / jnp.sqrt(rvar + BN_EPS)                 # (1, H)
    c_bn = beta - rmean * a_bn                             # (1, H)

    # A1: fc1 weight + fc1 bias + BN scale/shift, all 8-sublane aligned.
    A1 = jnp.zeros((A1_ROWS, HIDDEN), jnp.float32)
    A1 = A1.at[0:INPUT_DIM, :].set(w1_t)
    A1 = A1.at[ROW_B1, :].set(b1[0])
    A1 = A1.at[ROW_BNA, :].set(a_bn[0])
    A1 = A1.at[ROW_BNC, :].set(c_bn[0])

    # A2: fc2 weight + bias.
    A2 = jnp.concatenate([w2_t, b2], axis=0)               # (H+1, T)

    # AL: signed, leaf-expanded, temperature-folded split weights + biases.
    node_idx, signs = _leaf_path_table()                   # (Dep, L)
    gw = tw_t[:, :, node_idx] * signs[None, None] / temps[:, None, None, None]  # (T,D,Dep,L)
    W_leaf = jnp.transpose(gw, (1, 2, 0, 3)).reshape(INPUT_DIM, TREE_DEPTH, TL)
    W_leaf = jnp.pad(W_leaf, ((0, 0), (0, 0), (0, PAD - TL)))
    W_leaf = W_leaf.reshape(INPUT_DIM, AL_COLS)
    gb = tb[:, 0, node_idx] * signs[None] / temps[:, None, None]                # (T,Dep,L)
    b_leaf = jnp.transpose(gb, (1, 0, 2)).reshape(1, TREE_DEPTH, TL)
    b_leaf = jnp.pad(b_leaf, ((0, 0), (0, 0), (0, PAD - TL)))
    b_leaf = b_leaf.reshape(1, AL_COLS)
    AL = jnp.concatenate([W_leaf, b_leaf], axis=0)         # (D+1, 384)

    # OUT: block-diagonal leaf values (rows 0:32), zero padding rows (32:128),
    # and the shrinkage * residual_weight scale as the last row.
    eye = jnp.eye(NUM_TREES, dtype=jnp.float32)
    leaf_block = (tleaf[:, :, 0][:, :, None] * eye[:, None, :]).reshape(TL, NUM_TREES)
    OUT = jnp.concatenate([
        leaf_block,
        jnp.zeros((PAD - TL, NUM_TREES), jnp.float32),
        (SHRINKAGE * resw)[None, :],
    ], axis=0)                                             # (129, T)

    return A1, A2, AL, OUT


# --------------------------------------------------------------------------- #
# Pure-JAX reference matching the PyTorch forward (eval mode), unfused.
# --------------------------------------------------------------------------- #
def reference_forward(x, params):
    (w1_t, b1, gamma, beta, rmean, rvar, w2_t, b2,
     tw_t, tb, tleaf, temps, resw) = params
    missing = jnp.isnan(x)
    xc = jnp.where(missing, 0.0, x)
    missing_any = jnp.any(missing, axis=1, keepdims=True)
    h = jnp.maximum(x @ w1_t + b1, 0.0)
    h = (h - rmean) / jnp.sqrt(rvar + BN_EPS) * gamma + beta
    attn = jax.nn.softmax(h @ w2_t + b2, axis=1)
    pred = jnp.zeros((x.shape[0], NUM_CLASSES), jnp.float32)
    for t in range(NUM_TREES):
        routing = jnp.ones((x.shape[0], 1), jnp.float32)
        for d in range(TREE_DEPTH):
            lo, hi = 2 ** d - 1, 2 ** (d + 1) - 1
            logits = xc @ tw_t[t][:, lo:hi] + tb[t][:, lo:hi]
            dec = jax.nn.sigmoid(logits / temps[t])
            dec = jnp.where(missing_any, 0.5, dec)
            routing = jnp.concatenate([routing, routing], axis=1) \
                * jnp.concatenate([dec, 1.0 - dec], axis=1)
        tree_out = routing @ tleaf[t]
        pred = pred + attn[:, t:t + 1] * (SHRINKAGE * resw[t] * tree_out)
    return pred


def make_params(key):
    ks = jax.random.split(key, 6)
    w1_t = jax.random.normal(ks[0], (INPUT_DIM, HIDDEN), jnp.float32) * 0.1
    b1 = jnp.zeros((1, HIDDEN), jnp.float32)
    gamma = jnp.ones((1, HIDDEN), jnp.float32)
    beta = jnp.zeros((1, HIDDEN), jnp.float32)
    rmean = jnp.zeros((1, HIDDEN), jnp.float32)            # BN running stats (eval)
    rvar = jnp.ones((1, HIDDEN), jnp.float32)
    w2_t = jax.random.normal(ks[1], (HIDDEN, NUM_TREES), jnp.float32) * 0.1
    b2 = jnp.zeros((1, NUM_TREES), jnp.float32)
    tw_t = jax.random.normal(ks[2], (NUM_TREES, INPUT_DIM, NUM_NODES), jnp.float32)
    tb = jnp.zeros((NUM_TREES, 1, NUM_NODES), jnp.float32)
    tleaf = jax.random.normal(ks[3], (NUM_TREES, NUM_LEAVES, NUM_CLASSES), jnp.float32)
    temps = jnp.full((NUM_TREES,), 2.0, jnp.float32)
    resw = jax.nn.sigmoid(jax.random.normal(ks[4], (NUM_TREES,), jnp.float32))
    return (w1_t, b1, gamma, beta, rmean, rvar, w2_t, b2,
            tw_t, tb, tleaf, temps, resw)


if __name__ == "__main__":
    # TODO(synk): training-mode dropout / tree-skip and the non-regression output
    # activations are not exercised (module defaults: eval, task_type='regression').
    key = jax.random.PRNGKey(0)
    k_x, k_p = jax.random.split(key)
    x = jax.random.normal(k_x, (BATCH, INPUT_DIM), jnp.float32)
    params = make_params(k_p)
    packed = pack_params(params)

    out = torchboost_forward(x, *packed)
    out = jax.block_until_ready(out)

    ref = reference_forward(x, params)
    assert out.shape == (BATCH, NUM_CLASSES)
    assert jnp.allclose(out, ref, atol=1e-4, rtol=1e-4), (out, ref)
    print("KERNEL_OK")
</pallas_src>

<mosaic_0001>
module attributes {stable_mosaic.version = 11 : i64} {
  func.func @torchboost_kernel(%arg0: memref<8x16xf32, #tpu.memory_space<vmem>>, %arg1: memref<33x128xf32, #tpu.memory_space<vmem>>, %arg2: memref<129x4xf32, #tpu.memory_space<vmem>>, %arg3: memref<17x384xf32, #tpu.memory_space<vmem>>, %arg4: memref<129x4xf32, #tpu.memory_space<vmem>>, %arg5: memref<8x1xf32, #tpu.memory_space<vmem>>) attributes {dimension_semantics = [], scalar_prefetch = 0 : i64, scratch_operands = 0 : i64, tpu.core_type = #tpu.core_type<tc>} {
    %c0 = arith.constant 0 : index
    %c0_0 = arith.constant 0 : index
    %0 = vector.load %arg0[%c0, %c0_0] : memref<8x16xf32, #tpu.memory_space<vmem>>, vector<8x16xf32>
    %1 = arith.cmpf one, %0, %0 : vector<8x16xf32>
    %cst = arith.constant 0.000000e+00 : f32
    %2 = vector.broadcast %cst : f32 to vector<8x16xf32>
    %3 = arith.select %1, %2, %0 : vector<8x16xi1>, vector<8x16xf32>
    %4 = arith.extui %1 : vector<8x16xi1> to vector<8x16xi32>
    %5 = arith.sitofp %4 : vector<8x16xi32> to vector<8x16xf32>
    %cst_1 = arith.constant dense<0xFF800000> : vector<8xf32>
    %6 = vector.multi_reduction <maximumf>, %5, %cst_1 [1] : vector<8x16xf32> to vector<8xf32>
    %7 = vector.shape_cast %6 : vector<8xf32> to vector<8x1xf32>
    %cst_2 = arith.constant 0.000000e+00 : f32
    %8 = vector.broadcast %cst_2 : f32 to vector<8x1xf32>
    %9 = arith.cmpf ogt, %7, %8 : vector<8x1xf32>
    %c0_3 = arith.constant 0 : index
    %c0_4 = arith.constant 0 : index
    %10 = vector.load %arg1[%c0_3, %c0_4] : memref<33x128xf32, #tpu.memory_space<vmem>>, vector<16x128xf32>
    %cst_5 = arith.constant dense<0.000000e+00> : vector<8x128xf32>
    %11 = tpu.matmul %0, %10, %cst_5 {dimension_numbers = #tpu.dot_dimension_numbers<[1], [0], [0], [1], [0, 0, 1, 1], [], []>} : vector<8x16xf32>, vector<16x128xf32>, vector<8x128xf32> -> vector<8x128xf32>
    %c16 = arith.constant 16 : index
    %c0_6 = arith.constant 0 : index
    %12 = vector.load %arg1[%c16, %c0_6] : memref<33x128xf32, #tpu.memory_space<vmem>>, vector<1x128xf32>
    %13 = vector.broadcast %12 : vector<1x128xf32> to vector<8x128xf32>
    %14 = arith.addf %11, %13 : vector<8x128xf32>
    %cst_7 = arith.constant 0.000000e+00 : f32
    %15 = vector.broadcast %cst_7 : f32 to vector<8x128xf32>
    %16 = arith.maximumf %14, %15 : vector<8x128xf32>
    %c24 = arith.constant 24 : index
    %c0_8 = arith.constant 0 : index
    %17 = vector.load %arg1[%c24, %c0_8] : memref<33x128xf32, #tpu.memory_space<vmem>>, vector<1x128xf32>
    %18 = vector.broadcast %17 : vector<1x128xf32> to vector<8x128xf32>
    %19 = arith.mulf %16, %18 : vector<8x128xf32>
    %c32 = arith.constant 32 : index
    %c0_9 = arith.constant 0 : index
    %20 = vector.load %arg1[%c32, %c0_9] : memref<33x128xf32, #tpu.memory_space<vmem>>, vector<1x128xf32>
    %21 = vector.broadcast %20 : vector<1x128xf32> to vector<8x128xf32>
    %22 = arith.addf %19, %21 : vector<8x128xf32>
    %c0_10 = arith.constant 0 : index
    %c0_11 = arith.constant 0 : index
    %23 = vector.load %arg2[%c0_10, %c0_11] : memref<129x4xf32, #tpu.memory_space<vmem>>, vector<128x4xf32>
    %cst_12 = arith.constant dense<0.000000e+00> : vector<8x4xf32>
    %24 = tpu.matmul %22, %23, %cst_12 {dimension_numbers = #tpu.dot_dimension_numbers<[1], [0], [0], [1], [0, 0, 1, 1], [], []>} : vector<8x128xf32>, vector<128x4xf32>, vector<8x4xf32> -> vector<8x4xf32>
    %c128 = arith.constant 128 : index
    %c0_13 = arith.constant 0 : index
    %25 = vector.load %arg2[%c128, %c0_13] : memref<129x4xf32, #tpu.memory_space<vmem>>, vector<1x4xf32>
    %26 = vector.broadcast %25 : vector<1x4xf32> to vector<8x4xf32>
    %27 = arith.addf %24, %26 : vector<8x4xf32>
    %cst_14 = arith.constant dense<0xFF800000> : vector<8xf32>
    %28 = vector.multi_reduction <maximumf>, %27, %cst_14 [1] : vector<8x4xf32> to vector<8xf32>
    %29 = vector.shape_cast %28 : vector<8xf32> to vector<8x1xf32>
    %30 = vector.broadcast %29 : vector<8x1xf32> to vector<8x4xf32>
    %31 = arith.subf %27, %30 : vector<8x4xf32>
    %32 = math.exp %31 : vector<8x4xf32>
    %cst_15 = arith.constant dense<0.000000e+00> : vector<8xf32>
    %33 = vector.multi_reduction <add>, %32, %cst_15 [1] : vector<8x4xf32> to vector<8xf32>
    %34 = vector.shape_cast %33 : vector<8xf32> to vector<8x1xf32>
    %35 = tpu.reciprocal %34 : vector<8x1xf32> -> vector<8x1xf32>
    %36 = vector.broadcast %35 : vector<8x1xf32> to vector<8x4xf32>
    %37 = arith.mulf %32, %36 : vector<8x4xf32>
    %c0_16 = arith.constant 0 : index
    %c0_17 = arith.constant 0 : index
    %38 = vector.load %arg3[%c0_16, %c0_17] : memref<17x384xf32, #tpu.memory_space<vmem>>, vector<16x384xf32>
    %cst_18 = arith.constant dense<0.000000e+00> : vector<8x384xf32>
    %39 = tpu.matmul %3, %38, %cst_18 {dimension_numbers = #tpu.dot_dimension_numbers<[1], [0], [0], [1], [0, 0, 1, 1], [], []>} : vector<8x16xf32>, vector<16x384xf32>, vector<8x384xf32> -> vector<8x384xf32>
    %c16_19 = arith.constant 16 : index
    %c0_20 = arith.constant 0 : index
    %40 = vector.load %arg3[%c16_19, %c0_20] : memref<17x384xf32, #tpu.memory_space<vmem>>, vector<1x384xf32>
    %41 = vector.broadcast %40 : vector<1x384xf32> to vector<8x384xf32>
    %42 = arith.addf %39, %41 : vector<8x384xf32>
    %cst_21 = arith.constant 0.000000e+00 : f32
    %43 = vector.broadcast %cst_21 : f32 to vector<8x384xf32>
    %44 = arith.subf %43, %42 : vector<8x384xf32>
    %45 = math.exp %44 : vector<8x384xf32>
    %cst_22 = arith.constant 1.000000e+00 : f32
    %46 = vector.broadcast %cst_22 : f32 to vector<8x384xf32>
    %47 = arith.addf %46, %45 : vector<8x384xf32>
    %48 = tpu.reciprocal %47 : vector<8x384xf32> -> vector<8x384xf32>
    %cst_23 = arith.constant 5.000000e-01 : f32
    %49 = vector.broadcast %cst_23 : f32 to vector<8x384xf32>
    %50 = vector.shape_cast %9 : vector<8x1xi1> to vector<8x1xi1>
    %51 = vector.broadcast %50 : vector<8x1xi1> to vector<8x384xi1>
    %52 = arith.select %51, %49, %48 : vector<8x384xi1>, vector<8x384xf32>
    %53 = vector.extract_strided_slice %52 {offsets = [0, 0], sizes = [8, 128], strides = [1, 1]} : vector<8x384xf32> to vector<8x128xf32>
    %54 = vector.extract_strided_slice %52 {offsets = [0, 128], sizes = [8, 128], strides = [1, 1]} : vector<8x384xf32> to vector<8x128xf32>
    %55 = arith.mulf %53, %54 : vector<8x128xf32>
    %56 = vector.extract_strided_slice %52 {offsets = [0, 256], sizes = [8, 128], strides = [1, 1]} : vector<8x384xf32> to vector<8x128xf32>
    %57 = arith.mulf %55, %56 : vector<8x128xf32>
    %c0_24 = arith.constant 0 : index
    %c0_25 = arith.constant 0 : index
    %58 = vector.load %arg4[%c0_24, %c0_25] : memref<129x4xf32, #tpu.memory_space<vmem>>, vector<128x4xf32>
    %cst_26 = arith.constant dense<0.000000e+00> : vector<8x4xf32>
    %59 = tpu.matmul %57, %58, %cst_26 {dimension_numbers = #tpu.dot_dimension_numbers<[1], [0], [0], [1], [0, 0, 1, 1], [], []>} : vector<8x128xf32>, vector<128x4xf32>, vector<8x4xf32> -> vector<8x4xf32>
    %c128_27 = arith.constant 128 : index
    %c0_28 = arith.constant 0 : index
    %60 = vector.load %arg4[%c128_27, %c0_28] : memref<129x4xf32, #tpu.memory_space<vmem>>, vector<1x4xf32>
    %61 = vector.broadcast %60 : vector<1x4xf32> to vector<8x4xf32>
    %62 = arith.mulf %59, %61 : vector<8x4xf32>
    %63 = arith.mulf %37, %62 : vector<8x4xf32>
    %cst_29 = arith.constant dense<0.000000e+00> : vector<8xf32>
    %64 = vector.multi_reduction <add>, %63, %cst_29 [1] : vector<8x4xf32> to vector<8xf32>
    %65 = vector.shape_cast %64 : vector<8xf32> to vector<8x1xf32>
    %c0_30 = arith.constant 0 : index
    %c0_31 = arith.constant 0 : index
    %66 = vector.load %arg5[%c0_30, %c0_31] : memref<8x1xf32, #tpu.memory_space<vmem>>, vector<8x1xf32>
    tpu.vector_store %arg5[%c0_30, %c0_31], %65 {strides = array<i32>} : memref<8x1xf32, #tpu.memory_space<vmem>>, vector<8x1xf32>,
    return
  }
}

</mosaic_0001>

<bundles_post_ra>
// kernel: torchboost_forward.1
= control target key start
LH: loop header
LB: loop body
LE: loop exit
PB: predicated region body
PF: predicated region fallthrough
CT: control target
= control target key end

     0   :  { %v670_v0 = vmov 0.0   ;;  %vm671_vm0 = vmmov 0   ;;  %vm25_vm1 = vcmask 130048   ;;  %v235_v38 = vlaneseq  ;;  %s905_s1 = inlined_call_operand.vmem [shape: f32[33,128], index: 1, kind: input, shape index: {}]   ;;  %s906_s0 = inlined_call_operand.vmem [shape: f32[8,16], index: 0, kind: input, shape index: {}]   ;;  %s907_s2 = inlined_call_operand.vmem [shape: f32[129,4], index: 2, kind: input, shape index: {}]   ;;  %s908_s3 = inlined_call_operand.vmem [shape: f32[17,384], index: 3, kind: input, shape index: {}]   ;;  %s909_s4 = inlined_call_operand.vmem [shape: f32[129,4], index: 4, kind: input, shape index: {}]   ;;  %s910_s5 = inlined_call_operand.vmem [shape: f32[8,1], index: 5, kind: output, shape index: {}]  }
   0x1   :  { %568 = vmatprep.subr.mxu1 %v670_v0  ;;  %v31_v1 = vld [vmem:[%s905_s1 + $0x8] sm:$0xff]  ;;  %v30_v2 = vld [vmem:[%s905_s1] sm:$0xff]  ;;  %572 = vmatprep.mubr.msk.f32.mxu1 %vm671_vm0, %v670_v0  ;;  %v138_v4 = vld [vmem:[%s907_s2 + $0x78] sm:$0xff]  ;;  %vm214_vm4 = vcmask 31744   ;;  %vm512_vm5 = vcmask 7168  }
   0x2   :  { %569 = vmatpush3.msra.mxu1 %v31_v1  ;;  %v714_v3 = vld [vmem:[%s906_s0] sm:$0xff]  ;;  %317 = vmatprep.mubr.f32.mxu0 %v670_v0  ;;  %v137_v5 = vld [vmem:[%s907_s2 + $0x70] sm:$0xff]  ;;  %v136_v6 = vld [vmem:[%s907_s2 + $0x68] sm:$0xff]  ;;  %v236_v41 = vshrl.u32 %v235_v38, 7 }
   0x3   :  { %570 = vmatprep.subr.mxu1 %v670_v0  ;;  %v135_v7 = vld [vmem:[%s907_s2 + $0x60] sm:$0xff]  ;;  %v134_v8 = vld [vmem:[%s907_s2 + $0x58] sm:$0xff]  ;;  %v133_v9 = vld [vmem:[%s907_s2 + $0x50] sm:$0xff]  ;;  %vm21_vm2 = vcmp.ne.f32.partialorder %v714_v3, %v714_v3 }
   0x4   :  { %571 = vmatpush3.msra.mxu1 %v30_v2  ;;  %v132_v10 = vld [vmem:[%s907_s2 + $0x48] sm:$0xff]  ;;  %v131_v11 = vld [vmem:[%s907_s2 + $0x40] sm:$0xff]  ;;  %v130_v12 = vld [vmem:[%s907_s2 + $0x38] sm:$0xff]  ;;  %v518_v23 = vsel %vm21_vm2, 1.0, %v670_v0  ;;  %v22_v26 = vsel %vm21_vm2, 0.0, %v714_v3  ;;  %v237_v45 = vsub.s32 0, %v236_v41 }
   0x5   :  { %573 = vmatmul.mubr.msk.f32.vlgmr.msra.gmra.mxu1 %vm25_vm1, %v714_v3  ;;  %575 = vmatprep.subr.mxu1 %v670_v0  ;;  %v129_v13 = vld [vmem:[%s907_s2 + $0x30] sm:$0xff]  ;;  %v128_v14 = vld [vmem:[%s907_s2 + $0x28] sm:$0xff]  ;;  %v127_v15 = vld [vmem:[%s907_s2 + $0x20] sm:$0xff]  ;;  %v26_v25 = vsel %vm25_vm1, %v518_v23, -inf  ;;  %v241_v46 = vsub.s32 1, %v236_v41  ;;  %v245_v48 = vsub.s32 2, %v236_v41 }
   0x6   :  { %576 = vmatpush3.msra.mxu1 %v138_v4  ;;  %607 = vmatprep.mubr.msk.f32.mxu1 %vm671_vm0, %v670_v0  ;;  %v126_v16 = vld [vmem:[%s907_s2 + $0x18] sm:$0xff]  ;;  %v125_v17 = vld [vmem:[%s907_s2 + $0x10] sm:$0xff]  ;;  %v124_v18 = vld [vmem:[%s907_s2 + $0x8] sm:$0xff] }
   0x7   :  { %577 = vmatprep.subr.mxu1 %v670_v0  ;;  %v123_v19 = vld [vmem:[%s907_s2] sm:$0xff]  ;;  %v229_v21 = vld [vmem:[%s908_s3 + $0x18] sm:$0xff]  ;;  %v227_v22 = vld [vmem:[%s908_s3 + $0x8] sm:$0xff]  ;;  %27 = vmax.xlane.f32.xlu0 %v26_v25 }
   0x8   :  { %578 = vmatpush3.msra.mxu1 %v137_v5  ;;  %v230_v20 = vld [vmem:[%s908_s3 + $0x20] sm:$0xff]  ;;  %v231_v27 = vld [vmem:[%s908_s3 + $0x28] sm:$0xff]  ;;  %v228_v28 = vld [vmem:[%s908_s3 + $0x10] sm:$0xff] }
   0x9   :  { %579 = vmatprep.subr.mxu1 %v670_v0  ;;  %281 = vmatprep.subr.mxu0 %v230_v20  ;;  %v226_v24 = vld [vmem:[%s908_s3] sm:$0xff]  ;;  %v519_v29 = vld [vmem:[%s905_s1 + $0x10] ss:$0 sm:$0xff]  ;;  %v521_v32 = vld [vmem:[%s905_s1 + $0x18] ss:$0 sm:$0xff] }
   0xa   :  { %580 = vmatpush3.msra.mxu1 %v136_v6  ;;  %282 = vmatpush1.msra.mxu0 %v229_v21  ;;  %v522_v35 = vld [vmem:[%s905_s1 + $0x20] ss:$0 sm:$0xff]  ;;  %v431_v39 = vld [vmem:[%s909_s4 + $0x78] sm:$0xff]  ;;  %v430_v40 = vld [vmem:[%s909_s4 + $0x70] sm:$0xff] }
   0xb   :  { %581 = vmatprep.subr.mxu1 %v670_v0  ;;  %283 = vmatprep.subr.mxu0 %v227_v22  ;;  %v524_v43 = vld [vmem:[%s908_s3 + $0x30] ss:$8 sm:$0x7]  ;;  %v429_v44 = vld [vmem:[%s909_s4 + $0x68] sm:$0xff] }
   0xc   :  { %582 = vmatpush3.msra.mxu1 %v135_v7  ;;  %284 = vmatpush1.msra.mxu0 %v226_v24  ;;  %v428_v49 = vld [vmem:[%s909_s4 + $0x60] sm:$0xff]  ;;  %v238_v50 = vrot.slane %v524_v43, %v237_v45  ;;  %v242_v51 = vrot.slane %v524_v43, %v241_v46  ;;  %v246_v52 = vrot.slane %v524_v43, %v245_v48  ;;  %v427_v54 = vld [vmem:[%s909_s4 + $0x58] sm:$0xff]  ;;  %v426_v59 = vld [vmem:[%s909_s4 + $0x50] sm:$0xff] }
   0xd   :  { %583 = vmatprep.subr.mxu1 %v670_v0  ;;  %525 = vmatmul.mubr.msk.f32.vlgmr.msra.gmra.mxu0 %vm25_vm1, %v22_v26  ;;  %v425_v63 = vld [vmem:[%s909_s4 + $0x48] sm:$0xff]  ;;  %v424_v4 = vld [vmem:[%s909_s4 + $0x40] sm:$0xff]  ;;  %v423_v5 = vld [vmem:[%s909_s4 + $0x38] sm:$0xff] }
   0xe   :  { %584 = vmatpush3.msra.mxu1 %v134_v8  ;;  %610 = vmatprep.subr.mxu0 %v670_v0  ;;  %v422_v6 = vld [vmem:[%s909_s4 + $0x30] sm:$0xff]  ;;  %v421_v7 = vld [vmem:[%s909_s4 + $0x28] sm:$0xff]  ;;  %v420_v8 = vld [vmem:[%s909_s4 + $0x20] sm:$0xff] }
   0xf   :  { %585 = vmatprep.subr.mxu1 %v670_v0  ;;  %611 = vmatpush3.msra.mxu0 %v231_v27 }
  0x10   :  { %586 = vmatpush3.msra.mxu1 %v133_v9  ;;  %614 = vmatprep.mubr.msk.f32.mxu0 %vm671_vm0, %v670_v0  ;;  %v419_v9 = vld [vmem:[%s909_s4 + $0x18] sm:$0xff] }
  0x11   :  { %587 = vmatprep.subr.mxu1 %v670_v0  ;;  %612 = vmatprep.subr.mxu0 %v670_v0 }
  0x12   :  { %588 = vmatpush3.msra.mxu1 %v132_v10  ;;  %613 = vmatpush3.msra.mxu0 %v228_v28  ;;  %v418_v10 = vld [vmem:[%s909_s4 + $0x10] sm:$0xff]  ;;  %v523_v28 = vld [vmem:[%s907_s2 + $0x80] ss:$0 sm:$0xff] }
  0x13   :  { %589 = vmatprep.subr.mxu1 %v670_v0  ;;  %615 = vmatmul.mubr.msk.f32.vlgmr.msra.gmra.mxu0 %vm25_vm1, %v22_v26 }
  0x14   :  { %590 = vmatpush3.msra.mxu1 %v131_v11  ;;  %617 = vmatprep.subr.mxu0 %v670_v0 }
  0x15   :  { %591 = vmatprep.subr.mxu1 %v670_v0  ;;  %649 = vmatprep.mubr.msk.f32.mxu0 %vm671_vm0, %v670_v0 }
  0x16   :  { %592 = vmatpush3.msra.mxu1 %v130_v12  ;;  %618 = vmatpush3.msra.mxu0 %v431_v39  ;;  %v417_v12 = vld [vmem:[%s909_s4 + $0x8] sm:$0xff] }
  0x17   :  { %593 = vmatprep.subr.mxu1 %v670_v0  ;;  %619 = vmatprep.subr.mxu0 %v670_v0 }
  0x18   :  { %594 = vmatpush3.msra.mxu1 %v129_v13  ;;  %620 = vmatpush3.msra.mxu0 %v430_v40  ;;  %v527_v40 = vld [vmem:[%s909_s4 + $0x80] ss:$0 sm:$0xff] }
  0x19   :  { %595 = vmatprep.subr.mxu1 %v670_v0  ;;  %621 = vmatprep.subr.mxu0 %v670_v0 }
  0x1a   :  { %596 = vmatpush3.msra.mxu1 %v128_v14  ;;  %622 = vmatpush3.msra.mxu0 %v429_v44 }
  0x1b   :  { %597 = vmatprep.subr.mxu1 %v670_v0  ;;  %623 = vmatprep.subr.mxu0 %v670_v0 }
  0x1c   :  { %598 = vmatpush3.msra.mxu1 %v127_v15  ;;  %624 = vmatpush3.msra.mxu0 %v428_v49 }
  0x1d   :  { %599 = vmatprep.subr.mxu1 %v670_v0  ;;  %625 = vmatprep.subr.mxu0 %v670_v0 }
  0x1e   :  { %600 = vmatpush3.msra.mxu1 %v126_v16  ;;  %626 = vmatpush3.msra.mxu0 %v427_v54 }
  0x1f   :  { %601 = vmatprep.subr.mxu1 %v670_v0  ;;  %627 = vmatprep.subr.mxu0 %v670_v0 }
  0x20   :  { %602 = vmatpush3.msra.mxu1 %v125_v17  ;;  %628 = vmatpush3.msra.mxu0 %v426_v59  ;;  %v416_v17 = vld [vmem:[%s909_s4] sm:$0xff] }
  0x21   :  { %603 = vmatprep.subr.mxu1 %v670_v0  ;;  %629 = vmatprep.subr.mxu0 %v670_v0 }
  0x22   :  { %604 = vmatpush3.msra.mxu1 %v124_v18  ;;  %630 = vmatpush3.msra.mxu0 %v425_v63 }
  0x23   :  { %605 = vmatprep.subr.mxu1 %v670_v0  ;;  %631 = vmatprep.subr.mxu0 %v670_v0 }
  0x24   :  { %606 = vmatpush3.msra.mxu1 %v123_v19  ;;  %632 = vmatpush3.msra.mxu0 %v424_v4 }
  0x25   :  { %633 = vmatprep.subr.mxu0 %v670_v0 }
  0x26   :  { %634 = vmatpush3.msra.mxu0 %v423_v5 }
  0x27   :  { %635 = vmatprep.subr.mxu0 %v670_v0 }
  0x28   :  { %636 = vmatpush3.msra.mxu0 %v422_v6 }
  0x29   :  { %637 = vmatprep.subr.mxu0 %v670_v0 }
  0x2a   :  { %638 = vmatpush3.msra.mxu0 %v421_v7 }
  0x2b   :  { %639 = vmatprep.subr.mxu0 %v670_v0 }
  0x2c   :  { %640 = vmatpush3.msra.mxu0 %v420_v8 }
  0x2d   :  { %641 = vmatprep.subr.mxu0 %v670_v0 }
  0x2e   :  { %642 = vmatpush3.msra.mxu0 %v419_v9 }
  0x2f   :  { %643 = vmatprep.subr.mxu0 %v670_v0 }
  0x30   :  { %644 = vmatpush3.msra.mxu0 %v418_v10 }
  0x31   :  { %645 = vmatprep.subr.mxu0 %v670_v0 }
  0x32   :  { %646 = vmatpush3.msra.mxu0 %v417_v12 }
  0x33   :  { %647 = vmatprep.subr.mxu0 %v670_v0 }
  0x34   :  { %648 = vmatpush3.msra.mxu0 %v416_v17 }
  0x90   :  { %v28_v19 = vpop.xlane.xlu0 %27 }
  0x91   :  { %vm29_vm3 = vcmp.gt.f32.partialorder %v28_v19, 0.0 }
  0xc5   :  { %v106_v30 = vpop.f32.mrf.mxu1 }
  0xc6   :  { %v107_v31 = vadd.f32 %v519_v29, %v106_v30 }
  0xc7   :  { %v574_v33 = vpop.f32.mrf.mxu1 }
  0xc8   :  { %v110_v34 = vmax.f32 %v107_v31, 0.0 }
  0xca   :  { %v116_v36 = vmul.f32 %v521_v32, %v110_v34 }
  0xcc   :  { %v122_v37 = vadd.f32 %v522_v35, %v116_v36 }
  0xcd   :  { %v319_v42 = vpop.f32.mrf.mxu0 }
  0xce   :  { %608 = vmatmul.mubr.f32.vlgmr.msra.gmra.mxu1 %v122_v37  ;;  %v320_v55 = vadd.f32 %v319_v42, %v238_v50 }
  0xcf   :  { %v321_v47 = vpop.f32.mrf.mxu0 }
  0xd0   :  { %v322_v56 = vadd.f32 %v321_v47, %v242_v51  ;;  %v394_v60 = vsub.f32 0.0, %v320_v55 }
  0xd2   :  { %v395_v61 = vsub.f32 0.0, %v322_v56  ;;  %v397_v1 = vmul.f32 1.442695, %v394_v60 }
  0xd3   :  { %v390_v53 = vpop.f32.mrf.mxu0 }
  0xd4   :  { %v391_v57 = vadd.f32 %v390_v53, %v246_v52  ;;  %v399_v2 = vmul.f32 1.442695, %v395_v61  ;;  %654 = vpow2.f32 %v397_v1 }
  0xd5   :  { %v616_v58 = vpop.f32.mrf.mxu0 }
  0xd6   :  { %v396_v62 = vsub.f32 0.0, %v391_v57  ;;  %656 = vpow2.f32 %v399_v2 }
  0xd8   :  { %v401_v3 = vmul.f32 1.442695, %v396_v62 }
  0xda   :  { %658 = vpow2.f32 %v401_v3 }
  0xe1   :  { %v655_v11 = vpop.eup %654 }
  0xe2   :  { %v403_v14 = vadd.f32 1.0, %v655_v11 }
  0xe3   :  { %v657_v13 = vpop.eup %656 }
  0xe4   :  { %v404_v16 = vadd.f32 1.0, %v657_v13  ;;  %660 = vrcp.f32 %v403_v14 }
  0xe6   :  { %662 = vrcp.f32 %v404_v16 }
  0xe7   :  { %v659_v15 = vpop.eup %658 }
  0xe8   :  { %v405_v18 = vadd.f32 1.0, %v659_v15 }
  0xea   :  { %664 = vrcp.f32 %v405_v18 }
  0xf1   :  { %v661_v20 = vpop.eup %660 }
  0xf2   :  { %v411_v22 = vsel %vm29_vm3, 0.5, %v661_v20 }
  0xf3   :  { %v663_v21 = vpop.eup %662 }
  0xf4   :  { %v412_v24 = vsel %vm29_vm3, 0.5, %v663_v21 }
  0xf5   :  { %v414_v26 = vmul.f32 %v412_v24, %v411_v22 }
  0xf7   :  { %v665_v23 = vpop.eup %664 }
  0xf8   :  { %v413_v25 = vsel %vm29_vm3, 0.5, %v665_v23 }
  0xf9   :  { %v415_v27 = vmul.f32 %v414_v26, %v413_v25 }
  0xfb   :  { %650 = vmatmul.mubr.f32.vlgmr.msra.gmra.mxu0 %v415_v27 }
 0x18e   :  { %v210_v29 = vpop.f32.mrf.mxu1 }
 0x18f   :  { %v211_v0 = vadd.f32 %v523_v28, %v210_v29 }
 0x190   :  { %v609_v30 = vpop.f32.mrf.mxu1 }
 0x191   :  { %v215_v31 = vsel %vm214_vm4, %v211_v0, -inf }
 0x192   :  { %216 = vmax.xlane.f32.xlu0 %v215_v31 }
 0x1bb   :  { %v498_v37 = vpop.f32.mrf.mxu0 }
 0x1bc   :  { %v507_v42 = vmul.f32 %v527_v40, %v498_v37 }
 0x1bd   :  { %v651_v38 = vpop.f32.mrf.mxu0 }
 0x21b   :  { %v217_v32 = vpop.xlane.xlu0 %216 }
 0x21c   :  { %v218_v33 = vsub.f32 %v211_v0, %v217_v32 }
 0x21e   :  { %v219_v34 = vmul.f32 1.442695, %v218_v33 }
 0x220   :  { %666 = vpow2.f32 %v219_v34 }
 0x22d   :  { %v667_v35 = vpop.eup %666 }
 0x22e   :  { %v221_v36 = vsel %vm214_vm4, %v667_v35, 0.0 }
 0x22f   :  { %222 = vadd.xlane.f32.xlu1 %v221_v36 }
 0x2b8   :  { %v223_v39 = vpop.xlane.xlu1 %222 }
 0x2b9   :  { %668 = vrcp.f32 %v223_v39 }
 0x2c6   :  { %v669_v41 = vpop.eup %668 }
 0x2c7   :  { %v225_v43 = vmul.f32 %v669_v41, %v667_v35 }
 0x2c9   :  { %v508_v44 = vmul.f32 %v507_v42, %v225_v43 }
 0x2cb   :  { %v509_v45 = vsel %vm214_vm4, %v508_v44, 0.0 }
 0x2cc   :  { %510 = vadd.xlane.f32.xlu1 %v509_v45 }
 0x355   :  { %v511_v46 = vpop.xlane.xlu1 %510 }
 0x356   :  { %513 = vst.msk [vmem:[%s910_s5] sm:$0xff] %vm512_vm5, %v511_v46 }

</bundles_post_ra>
